<compile_context>
chip_gen: v5e
topology: v5e:2x2
jax: 0.10.0
libtpu: 0.0.40
codegen_flags: <defaults>
</compile_context>

<pallas_src>
import functools

import jax
import jax.numpy as jnp
from jax.experimental import pallas as pl
from jax.experimental.pallas import tpu as pltpu


def _layernorm_kernel(x_ref, b_ref, o_ref, *, eps):
    # x_ref: (tile_rows, D), b_ref: (1, D), o_ref: (tile_rows, D)
    x = x_ref[...].astype(jnp.float32)
    d = x.shape[-1]
    mean = jnp.mean(x, axis=-1, keepdims=True)
    diff = x - mean
    # unbiased variance (matches torch.std default, ddof=1); reductions kept
    # back-to-back so the XLU sweeps the resident tile consecutively.
    var = jnp.sum(diff * diff, axis=-1, keepdims=True) * (1.0 / (d - 1))
    std = jnp.sqrt(var)
    # eps added to std (reference quirk); reciprocal on the EUP, exact
    # (approx=False) to preserve 1e-5 agreement with the divide-based reference.
    inv = pl.reciprocal(eps + std, approx=False)
    out = diff * inv + b_ref[...].astype(jnp.float32)
    o_ref[...] = out.astype(o_ref.dtype)


def _choose_tile_rows(rows, d, itemsize,
                      target_block_bytes=2 << 20,      # ~2 MiB block ≈ 85% HBM BW
                      live_budget_bytes=24 << 20):     # (in+out) x 2 bufs cap (v7x 64 MiB VMEM)
    row_bytes = d * itemsize
    tr = max(8, target_block_bytes // row_bytes)
    # keep total live VMEM = 4 * tile_bytes under budget (v7x-safe, v5e/v6e trivially fine)
    tr = min(tr, max(8, live_budget_bytes // (4 * row_bytes)))
    # no point tiling beyond the (sublane-rounded) row count
    tr = min(tr, max(8, ((rows + 7) // 8) * 8))
    # multiple of 8 sublanes
    tr = max(8, (tr // 8) * 8)
    return int(tr)


def pallas_layernorm(x2d, b, *, eps=1e-9, tile_rows=None,
                     vmem_limit_bytes=48 * 1024 * 1024):
    """x2d: (rows, D), b: (D,) -> (rows, D). Normalization over last dim."""
    rows, d = x2d.shape
    assert d > 1, "LayerNorm over a size-1 dim is degenerate (unbiased std divides by D-1)"

    if tile_rows is None:
        tile_rows = _choose_tile_rows(rows, d, jnp.dtype(x2d.dtype).itemsize)

    # Pad rows to a multiple of tile_rows (padded rows compute harmless values
    # and are sliced off), so the performance-optimal tile works on any shape.
    n_blocks = (rows + tile_rows - 1) // tile_rows
    rows_padded = n_blocks * tile_rows
    xp = x2d if rows_padded == rows else jnp.pad(x2d, ((0, rows_padded - rows), (0, 0)))

    b2d = b.reshape(1, d).astype(x2d.dtype)
    kernel = functools.partial(_layernorm_kernel, eps=eps)

    out = pl.pallas_call(
        kernel,
        out_shape=jax.ShapeDtypeStruct((rows_padded, d), x2d.dtype),
        grid_spec=pltpu.PrefetchScalarGridSpec(
            num_scalar_prefetch=0,
            grid=(n_blocks,),
            in_specs=[
                pl.BlockSpec((tile_rows, d), lambda i: (i, 0)),
                pl.BlockSpec((1, d), lambda i: (0, 0)),
            ],
            out_specs=pl.BlockSpec((tile_rows, d), lambda i: (i, 0)),
        ),
        compiler_params=pltpu.CompilerParams(
            # parallel grid axis: lets the v7x runtime shard grid steps across
            # its 2 TensorCores; no-op on single-TC v5e/v6e.
            dimension_semantics=("parallel",),
            vmem_limit_bytes=vmem_limit_bytes,
        ),
    )(xp, b2d)

    return out if rows_padded == rows else out[:rows]


class LayerNormPallas:
    """JAX/Pallas port of the PyTorch LayerNorm(size, eps) module."""

    def __init__(self, size, eps=1e-9):
        self.size = size
        self.eps = eps
        # Parameters initialized exactly as in the reference __init__.
        self.a = jnp.ones((size,), dtype=jnp.float32)   # unused in forward (matches reference)
        self.b = jnp.zeros((size,), dtype=jnp.float32)

    def __call__(self, x):
        *lead, d = x.shape
        assert d == self.size
        rows = 1
        for s in lead:
            rows *= s
        y = pallas_layernorm(x.reshape(rows, d), self.b, eps=self.eps)
        return y.reshape(*lead, d)


def _reference_layernorm(x, b, eps=1e-9):
    mean = jnp.mean(x, axis=-1, keepdims=True)
    d = x.shape[-1]
    var = jnp.sum((x - mean) ** 2, axis=-1, keepdims=True) / (d - 1)
    std = jnp.sqrt(var)
    return (x - mean) / (eps + std) + b


if __name__ == "__main__":
    key = jax.random.PRNGKey(0)

    # Small demo, hidden chosen lane-dense (multiple of 128) per perf guidance.
    batch, seq, hidden = 2, 8, 128
    kx, kx2 = jax.random.split(key)
    x = jax.random.normal(kx, (batch, seq, hidden), dtype=jnp.float32)

    ln = LayerNormPallas(size=hidden)
    out = jax.block_until_ready(ln(x))

    ref = _reference_layernorm(x, ln.b)
    assert out.shape == x.shape
    assert jnp.allclose(out, ref, atol=1e-5, rtol=1e-5), "mismatch vs reference"

    # Also exercise the non-divisible-rows (padding) path.
    x2 = jax.random.normal(kx2, (3, 7, hidden), dtype=jnp.float32)  # rows = 21
    out2 = jax.block_until_ready(ln(x2))
    ref2 = _reference_layernorm(x2, ln.b)
    assert out2.shape == x2.shape
    assert jnp.allclose(out2, ref2, atol=1e-5, rtol=1e-5), "mismatch vs reference (padded path)"

    print("KERNEL_OK")
</pallas_src>

<mosaic_0001>
module attributes {stable_mosaic.version = 11 : i64} {
  func.func @_layernorm_kernel(%arg0: i32, %arg1: memref<16x128xf32, #tpu.memory_space<vmem>>, %arg2: memref<1x128xf32, #tpu.memory_space<vmem>>, %arg3: memref<16x128xf32, #tpu.memory_space<vmem>>) attributes {dimension_semantics = [#tpu.dimension_semantics<parallel>], iteration_bounds = array<i64: 1>, scalar_prefetch = 0 : i64, scratch_operands = 0 : i64, tpu.core_type = #tpu.core_type<tc>, window_params = [{transform_indices = @transform_0, window_bounds = array<i64: 16, 128>}, {pipeline_mode = #tpu.pipeline_mode<synchronous>, transform_indices = @transform_1, window_bounds = array<i64: 1, 128>}, {transform_indices = @transform_2, window_bounds = array<i64: 16, 128>}]} {
    %c0 = arith.constant 0 : index
    %c0_0 = arith.constant 0 : index
    %0 = vector.load %arg1[%c0, %c0_0] : memref<16x128xf32, #tpu.memory_space<vmem>>, vector<16x128xf32>
    %cst = arith.constant dense<0.000000e+00> : vector<16xf32>
    %1 = vector.multi_reduction <add>, %0, %cst [1] : vector<16x128xf32> to vector<16xf32>
    %2 = vector.shape_cast %1 : vector<16xf32> to vector<16x1xf32>
    %cst_1 = arith.constant 1.280000e+02 : f32
    %3 = vector.broadcast %cst_1 : f32 to vector<16x1xf32>
    %4 = arith.divf %2, %3 : vector<16x1xf32>
    %5 = vector.broadcast %4 : vector<16x1xf32> to vector<16x128xf32>
    %6 = arith.subf %0, %5 : vector<16x128xf32>
    %7 = arith.mulf %6, %6 : vector<16x128xf32>
    %cst_2 = arith.constant dense<0.000000e+00> : vector<16xf32>
    %8 = vector.multi_reduction <add>, %7, %cst_2 [1] : vector<16x128xf32> to vector<16xf32>
    %9 = vector.shape_cast %8 : vector<16xf32> to vector<16x1xf32>
    %cst_3 = arith.constant 0.00787401571 : f32
    %10 = vector.broadcast %cst_3 : f32 to vector<16x1xf32>
    %11 = arith.mulf %9, %10 : vector<16x1xf32>
    %12 = math.sqrt %11 : vector<16x1xf32>
    %cst_4 = arith.constant 9.99999971E-10 : f32
    %13 = vector.broadcast %cst_4 : f32 to vector<16x1xf32>
    %14 = arith.addf %13, %12 : vector<16x1xf32>
    %15 = tpu.reciprocal %14 : vector<16x1xf32> -> vector<16x1xf32>
    %16 = vector.broadcast %15 : vector<16x1xf32> to vector<16x128xf32>
    %17 = arith.mulf %6, %16 : vector<16x128xf32>
    %c0_5 = arith.constant 0 : index
    %c0_6 = arith.constant 0 : index
    %18 = vector.load %arg2[%c0_5, %c0_6] : memref<1x128xf32, #tpu.memory_space<vmem>>, vector<1x128xf32>
    %19 = vector.broadcast %18 : vector<1x128xf32> to vector<16x128xf32>
    %20 = arith.addf %17, %19 : vector<16x128xf32>
    %c0_7 = arith.constant 0 : index
    %c0_8 = arith.constant 0 : index
    %21 = vector.load %arg3[%c0_7, %c0_8] : memref<16x128xf32, #tpu.memory_space<vmem>>, vector<16x128xf32>
    tpu.vector_store %arg3[%c0_7, %c0_8], %20 {strides = array<i32>} : memref<16x128xf32, #tpu.memory_space<vmem>>, vector<16x128xf32>,
    return
  }
  func.func @transform_0(%arg0: i32) -> (i32, i32) {
    %c0_i32 = arith.constant 0 : i32
    %c0_i32_0 = arith.constant 0 : i32
    return %arg0, %c0_i32 : i32, i32
  }
  func.func @transform_1(%arg0: i32) -> (i32, i32) {
    %c0_i32 = arith.constant 0 : i32
    %c0_i32_0 = arith.constant 0 : i32
    %c0_i32_1 = arith.constant 0 : i32
    return %c0_i32, %c0_i32_0 : i32, i32
  }
  func.func @transform_2(%arg0: i32) -> (i32, i32) {
    %c0_i32 = arith.constant 0 : i32
    %c0_i32_0 = arith.constant 0 : i32
    return %arg0, %c0_i32 : i32, i32
  }
}

</mosaic_0001>

<bundles_post_ra>
// kernel: tpu_custom_call.1
= control target key start
LH: loop header
LB: loop body
LE: loop exit
PB: predicated region body
PF: predicated region fallthrough
CT: control target
= control target key end

     0   :  { %7 = vsyncpa [#allocation3], 0  ;;  %s287_s0 = inlined_call_operand.hbm [shape: f32[16,128], index: 0, kind: input, shape index: {}]   ;;  %s288_s1 = inlined_call_operand.hbm [shape: f32[1,128], index: 1, kind: input, shape index: {}]   ;;  %s289_s2 = inlined_call_operand.hbm [shape: f32[16,128], index: 2, kind: output, shape index: {}]  }
   0x1   :  { %8 = vsyncpa [#allocation6], 0 }
   0x2   :  { %9 = vsyncpa [#allocation4], 0  ;;  %s14_s11 = sshll.u32 %s287_s0, 4  ;;  %s246_s12 = smov [#allocation2]   ;;  %s15_s11 = int_to_ptr.hbm [resolvable:$true] %s14_s11 }
   0x3   :  { %s16_s13 = sshll.u32 %s246_s12, 4  ;;  %s28_s16 = sshll.u32 %s288_s1, 4  ;;  %s17_s13 = int_to_ptr.vmem [resolvable:$true] %s16_s13  ;;  %s29_s16 = int_to_ptr.hbm [resolvable:$true] %s28_s16 }
   0x4   :  { %s247_s17 = smov 128   ;;  %s248_s18 = smov 8  }
   0x5   :  { %22 = dma.hbm_to_vmem [thread:$0]  %s15_s11, 256, %s17_s13, [#allocation3], %s247_s17, %s247_s17, %s248_s18  }
   0x6   :  { %s249_s19 = smov [#allocation5]  }
   0x7   :  { %s30_s20 = sshll.u32 %s249_s19, 4  ;;  %s31_s20 = int_to_ptr.vmem [resolvable:$true] %s30_s20 }
   0x8   :  { %33 = dma.hbm_to_vmem [thread:$0]  %s29_s16, 16, %s31_s20, [#allocation6]  }
   0x9   :  { %240 = dma.done.wait [#allocation3], 256  }
   0xa   :  { %241 = vsyncadd [#allocation3], 4294967040 }
   0xb   :  { %242 = dma.done.wait [#allocation6], 16  }
   0xc   :  { %243 = vsyncadd [#allocation6], 4294967280  ;;  %v42_v0 = vld [vmem:[#allocation2] sm:$0xff]  ;;  %v43_v1 = vld [vmem:[#allocation2 + $0x8] sm:$0xff]  ;;  %v250_v2 = vmov 128.0   ;;  %s251_s0 = smov [#allocation7]  }
   0xd   :  { %44 = vadd.xlane.f32.xlu0 %v42_v0  ;;  %158 = vrcp.f32 %v250_v2  ;;  %v157_v54 = vld [vmem:[#allocation5] ss:$0 sm:$0xff]  ;;  %s135_s1 = sshll.u32 %s251_s0, 4  ;;  %s137_s23 = sshll.u32 %s289_s2, 4  ;;  %s136_s1 = int_to_ptr.vmem [resolvable:$true] %s135_s1  ;;  %s138_s23 = int_to_ptr.hbm [resolvable:$true] %s137_s23 }
  0x13   :  { %v159_v3 = vpop.eup %158 }
  0x14   :  { %v49_v4 = vmul.f32 128.0, %v159_v3  ;;  %vm53_vm0 = vweird.f32 %v159_v3 }
  0x15   :  { %46 = vadd.xlane.f32.xlu0 %v43_v1 }
  0x16   :  { %v50_v5 = vsub.f32 1.0, %v49_v4 }
  0x18   :  { %v51_v6 = vmul.f32 %v159_v3, %v50_v5 }
  0x1a   :  { %v52_v7 = vadd.f32 %v159_v3, %v51_v6 }
  0x1c   :  { %v54_v8 = vsel %vm53_vm0, %v159_v3, %v52_v7 }
  0x80   :  { %v45_v9 = vpop.xlane.xlu0 %44 }
  0x81   :  { %v55_v10 = vmul.f32 %v54_v8, %v45_v9 }
  0x83   :  { %v57_v11 = vsub.f32 %v42_v0, %v55_v10 }
  0x85   :  { %v59_v12 = vmul.f32 %v57_v11, %v57_v11 }
  0x87   :  { %61 = vadd.xlane.f32.xlu1 %v59_v12 }
  0x88   :  { %v47_v13 = vpop.xlane.xlu0 %46 }
  0x89   :  { %v56_v14 = vmul.f32 %v54_v8, %v47_v13 }
  0x8b   :  { %v276_v15 = vsub.f32 %v43_v1, %v56_v14 }
  0x8d   :  { %v60_v16 = vmul.f32 %v276_v15, %v276_v15 }
  0x8f   :  { %63 = vadd.xlane.f32.xlu1 %v60_v16 }
  0xfa   :  { %v62_v17 = vpop.xlane.xlu1 %61 }
  0xfb   :  { %v65_v18 = vmul.f32 0.007874016, %v62_v17 }
  0xfd   :  { %160 = vrsqrt.f32 %v65_v18  ;;  %vm74_vm1 = vcmp.eq.f32.partialorder %v65_v18, inf  ;;  %v77_v31 = vand.u32 2147483648, %v65_v18  ;;  %vm76_vm2 = vcmp.eq.f32.partialorder %v65_v18, 0.0 }
 0x102   :  { %v64_v19 = vpop.xlane.xlu1 %63 }
 0x103   :  { %v161_v20 = vpop.eup %160  ;;  %v66_v21 = vmul.f32 0.007874016, %v64_v19 }
 0x104   :  { %v68_v22 = vmul.f32 %v161_v20, %v65_v18 }
 0x105   :  { %162 = vrsqrt.f32 %v66_v21  ;;  %vm86_vm3 = vcmp.eq.f32.partialorder %v66_v21, inf  ;;  %v89_v39 = vand.u32 2147483648, %v66_v21  ;;  %vm88_vm4 = vcmp.eq.f32.partialorder %v66_v21, 0.0 }
 0x106   :  { %v69_v23 = vmul.f32 %v161_v20, %v68_v22 }
 0x108   :  { %v70_v24 = vmul.f32 0.5, %v69_v23 }
 0x10a   :  { %v71_v25 = vsub.f32 1.5, %v70_v24 }
 0x10b   :  { %v163_v26 = vpop.eup %162 }
 0x10c   :  { %v72_v27 = vmul.f32 %v161_v20, %v71_v25  ;;  %v80_v28 = vmul.f32 %v163_v26, %v66_v21 }
 0x10e   :  { %v73_v29 = vmul.f32 %v72_v27, %v65_v18  ;;  %v81_v30 = vmul.f32 %v163_v26, %v80_v28 }
 0x110   :  { %v75_v32 = vsel %vm74_vm1, %v65_v18, %v73_v29  ;;  %v82_v33 = vmul.f32 0.5, %v81_v30 }
 0x111   :  { %v78_v34 = vsel %vm76_vm2, %v77_v31, %v75_v32 }
 0x112   :  { %v83_v35 = vsub.f32 1.5, %v82_v33  ;;  %v91_v36 = vadd.f32 1e-09, %v78_v34 }
 0x114   :  { %v84_v37 = vmul.f32 %v163_v26, %v83_v35  ;;  %164 = vrcp.f32 %v91_v36  ;;  %v104_v46 = vand.u32 2147483648, %v91_v36  ;;  %v102_v48 = vand.u32 2147483647, %v91_v36 }
 0x115   :  { %vm98_vm6 = vweird.f32 %v91_v36 }
 0x116   :  { %v85_v38 = vmul.f32 %v84_v37, %v66_v21  ;;  %v105_v51 = vor.u32 1.1754944e-38, %v104_v46  ;;  %vm103_vm8 = vcmp.eq.f32.partialorder %v102_v48, 8.507059e+37 }
 0x118   :  { %v87_v40 = vsel %vm86_vm3, %v66_v21, %v85_v38 }
 0x119   :  { %v90_v41 = vsel %vm88_vm4, %v89_v39, %v87_v40 }
 0x11a   :  { %v165_v42 = vpop.eup %164  ;;  %v92_v43 = vadd.f32 1e-09, %v90_v41 }
 0x11b   :  { %v94_v44 = vmul.f32 %v165_v42, %v91_v36  ;;  %vm99_vm5 = vweird.f32 %v165_v42 }
 0x11c   :  { %166 = vrcp.f32 %v92_v43  ;;  %vm100_vm7 = vmor %vm98_vm6, %vm99_vm5  ;;  %v118_v58 = vand.u32 2147483648, %v92_v43  ;;  %v116_v60 = vand.u32 2147483647, %v92_v43  ;;  %vm112_vm10 = vweird.f32 %v92_v43 }
 0x11d   :  { %v95_v45 = vsub.f32 1.0, %v94_v44 }
 0x11e   :  { %v119_v63 = vor.u32 1.1754944e-38, %v118_v58  ;;  %vm117_vm12 = vcmp.eq.f32.partialorder %v116_v60, 8.507059e+37 }
 0x11f   :  { %v96_v47 = vmul.f32 %v165_v42, %v95_v45 }
 0x121   :  { %v97_v49 = vadd.f32 %v165_v42, %v96_v47 }
 0x122   :  { %v167_v50 = vpop.eup %166 }
 0x123   :  { %v101_v52 = vsel %vm100_vm7, %v165_v42, %v97_v49  ;;  %v108_v53 = vmul.f32 %v167_v50, %v92_v43  ;;  %vm113_vm9 = vweird.f32 %v167_v50 }
 0x124   :  { %v106_v55 = vsel %vm103_vm8, %v105_v51, %v101_v52  ;;  %vm114_vm11 = vmor %vm112_vm10, %vm113_vm9 }
 0x125   :  { %v109_v56 = vsub.f32 1.0, %v108_v53  ;;  %v121_v57 = vmul.f32 %v106_v55, %v57_v11 }
 0x127   :  { %v110_v59 = vmul.f32 %v167_v50, %v109_v56  ;;  %v127_v61 = vadd.f32 %v157_v54, %v121_v57 }
 0x129   :  { %v111_v62 = vadd.f32 %v167_v50, %v110_v59  ;;  %129 = vst [vmem:[#allocation7] sm:$0xff] %v127_v61 }
 0x12b   :  { %v115_v0 = vsel %vm114_vm11, %v167_v50, %v111_v62 }
 0x12c   :  { %v120_v1 = vsel %vm117_vm12, %v119_v63, %v115_v0 }
 0x12d   :  { %v122_v2 = vmul.f32 %v120_v1, %v276_v15 }
 0x12f   :  { %v128_v3 = vadd.f32 %v157_v54, %v122_v2 }
 0x131   :  { %130 = vst [vmem:[#allocation7 + $0x8] sm:$0xff] %v128_v3 }
 0x132   :  { %143 = dma.vmem_to_hbm [thread:$0]  %s136_s1, 256, %s138_s23, [#allocation4], %s247_s17, %s247_s17, %s248_s18  }
 0x133   :  { %244 = dma.done.wait [#allocation4], 256  }
 0x134   :  { %245 = vsyncadd [#allocation4], 4294967040 }
 0x135   :  { %148 = vsyncpa [#allocation3], 1 }
 0x136   :  { %149 = vsyncpa [#allocation6], 1 }
 0x137   :  { %150 = vsyncpa [#allocation4], 1 }

</bundles_post_ra>
